<compile_context>
chip_gen: v7x
topology: tpu7x:2x2x1
jax: 0.10.0
libtpu: 0.0.40
codegen_flags: <defaults>
</compile_context>

<pallas_src>
import functools
import math

import jax
import jax.numpy as jnp
from jax.experimental import pallas as pl
from jax.experimental.pallas import tpu as pltpu


SCALE = (1, 3, 5, 7)          # MultiScaleDWConv kernel sizes
MAX_TILE_LANES = 1024         # per-grid-step lane-tile cap (sweepable)


def _group_channels(dim, scale=SCALE):
    n = len(scale)
    return tuple([dim - dim // n * (n - 1)] + [dim // n] * (n - 1))


def _gelu(x):
    # PyTorch nn.GELU default = exact (erf-based) GELU.  (approximate="tanh"
    # would move work onto the EUP slot; kept exact to match module semantics.)
    return jax.nn.gelu(x, approximate=False)


# ---------------------------------------------------------------------------
# pltpu.roll direction probe (one tiny kernel, run once, cached) — makes the
# DW-conv shift sign robust to the rotate-direction convention of tpu.rotate.
# ---------------------------------------------------------------------------
_ROLL_IS_JNP_LIKE = None


def _roll_probe_kernel(x_ref, o_ref):
    o_ref[...] = pltpu.roll(x_ref[...], 1, axis=1)


def _roll_is_jnp_like():
    """True iff pltpu.roll(x, s, ax) == jnp.roll(x, s, ax)  (out[i] = in[i-s])."""
    global _ROLL_IS_JNP_LIKE
    if _ROLL_IS_JNP_LIKE is None:
        with jax.ensure_compile_time_eval():
            x = jnp.arange(8 * 128, dtype=jnp.float32).reshape(8, 128)
            y = pl.pallas_call(
                _roll_probe_kernel,
                out_shape=jax.ShapeDtypeStruct((8, 128), jnp.float32),
            )(x)
            _ROLL_IS_JNP_LIKE = bool(y[0, 0] == x[0, 127])
    return _ROLL_IS_JNP_LIKE


def _shift_lanes(x, offset, length, roll_is_jnp_like):
    """Return v with v[:, p] = x[:, p + offset] (wrapped lanes masked by caller)."""
    offset = offset % length
    if offset == 0:
        return x
    shift = (length - offset) if roll_is_jnp_like else offset
    return pltpu.roll(x, shift, axis=1)


# ---------------------------------------------------------------------------
# Kernel (one spatial branch, one lane tile of whole images per grid step)
# ---------------------------------------------------------------------------
def mlp_plus_branch_kernel(*refs, height, width, chans, scale, roll_is_jnp_like):
    ng = len(chans)
    (x_ref, w1_ref, bn1s_ref, bn1b_ref, dww_ref, dwb_ref,
     bn2s_ref, bn2b_ref) = refs[:8]
    w2g_refs = refs[8:8 + ng]
    bn3s_ref, bn3b_ref, o_ref = refs[8 + ng:]

    tile_l = x_ref.shape[0]
    hw = height * width

    # ---- fc1: 1x1 conv (no bias) -> GELU -> folded BatchNorm ----------------
    # [hid, Cin] x [TILE_L, Cin] contracted on Cin (rhs-transposed MXU matmul),
    # result is already in the lane-dense [hid, TILE_L] layout.
    h = jax.lax.dot_general(
        w1_ref[...], x_ref[...], (((1,), (1,)), ((), ())),
        preferred_element_type=jnp.float32)                      # [hid, TILE_L]
    h = _gelu(h)
    h = h * bn1s_ref[...] + bn1b_ref[...]

    dwb = dwb_ref[...]                                           # [hid, 1]

    # per-lane (row, col) coordinates inside each image of this tile
    pos = jax.lax.broadcasted_iota(jnp.int32, (1, tile_l), 1) % hw
    row = pos // width
    col = pos % width

    # ---- MultiScaleDWConv + skip, GELU, BN2, group-wise fc2 accumulation ----
    out = None
    c0 = 0
    for ksz, c, w2g_ref in zip(scale, chans, w2g_refs):
        hg = h[c0:c0 + c, :]                                     # [c, TILE_L]
        acc = hg + dwb[c0:c0 + c, :]              # residual skip + DW-conv bias
        off = (7 - ksz) // 2
        for dy in range(off, off + ksz):
            ry = dy - 3
            if ry > 0:
                row_ok = row < (height - ry)
            elif ry < 0:
                row_ok = row >= (-ry)
            else:
                row_ok = None                     # centre row: statically valid
            for dx in range(off, off + ksz):
                rx = dx - 3
                src = _shift_lanes(hg, ry * width + rx, tile_l, roll_is_jnp_like)
                if rx > 0:
                    m = col < (width - rx)
                elif rx < 0:
                    m = col >= (-rx)
                else:
                    m = None                      # centre column
                if row_ok is not None:
                    m = row_ok if m is None else jnp.logical_and(m, row_ok)
                if m is not None:
                    src = jnp.where(m, src, 0.0)
                w_t = dww_ref[dy * 7 + dx][c0:c0 + c, :]         # [c, 1] column
                acc = acc + src * w_t
        acc = _gelu(acc)
        acc = acc * bn2s_ref[c0:c0 + c, :] + bn2b_ref[c0:c0 + c, :]
        # fc2 for this channel group: out += w2[:, c0:c0+c] @ y_g (MXU, f32 acc)
        part = jax.lax.dot_general(
            w2g_ref[...], acc.astype(w2g_ref.dtype), (((1,), (0,)), ((), ())),
            preferred_element_type=jnp.float32)                  # [Cout, TILE_L]
        out = part if out is None else out + part
        c0 += c

    out = out * bn3s_ref[...] + bn3b_ref[...]                    # folded BN3
    o_ref[...] = out.astype(o_ref.dtype)                         # lane-dense vst


# ---------------------------------------------------------------------------
# pallas_call wrapper (one spatial branch)
# ---------------------------------------------------------------------------
def _choose_imgs_per_tile(batch, hw, max_tile_lanes=MAX_TILE_LANES):
    """Whole-image lane tiles with (imgs*hw) % 128 == 0 and imgs | batch."""
    base = None
    for m in range(1, batch + 1):
        if batch % m == 0 and (m * hw) % 128 == 0:
            base = m
            break
    if base is None:
        return batch              # fall back to a single full-extent block
    best = base
    for m in range(base, batch + 1, base):
        if batch % m != 0:
            continue
        if m * hw > max_tile_lanes:
            break
        best = m
    return best


def run_mlp_plus_branch(x2d, params, *, height, width,
                        compute_dtype=jnp.bfloat16,
                        max_tile_lanes=MAX_TILE_LANES):
    """x2d: [batch*H*W, Cin] token-major branch slab; returns [Cout, batch*H*W]."""
    total_l, cin = x2d.shape
    hw = height * width
    assert total_l % hw == 0
    batch = total_l // hw
    hidden = params["w1t"].shape[0]
    cout = params["w2t"].shape[0]
    chans = _group_channels(hidden)
    # NOTE: keep hidden % (8 * len(SCALE)) == 0 in production so channel-group
    # boundaries stay sublane-(8-)aligned and the slices below are free.

    imgs = _choose_imgs_per_tile(batch, hw, max_tile_lanes)
    tile_l = imgs * hw
    grid = (total_l // tile_l,)

    # bf16 operands for the MXU; BN / depthwise-conv parameters stay f32.
    xb = x2d.astype(compute_dtype)
    w1 = params["w1t"].astype(compute_dtype)
    dww = jnp.transpose(params["dw_w"], (1, 0))[:, :, None]      # [49, hid, 1]
    w2_groups = []
    c0 = 0
    for c in chans:
        w2_groups.append(params["w2t"][:, c0:c0 + c].astype(compute_dtype))
        c0 += c

    args = (xb, w1, params["bn1_s"], params["bn1_b"], dww, params["dw_b"],
            params["bn2_s"], params["bn2_b"], *w2_groups,
            params["bn3_s"], params["bn3_b"])

    def const_spec(shape):
        zeros = (0,) * len(shape)
        return pl.BlockSpec(shape, lambda i, _z=zeros: _z)       # VMEM-resident

    in_specs = [pl.BlockSpec((tile_l, cin), lambda i: (i, 0))]
    in_specs += [const_spec(a.shape) for a in args[1:]]
    out_specs = pl.BlockSpec((cout, tile_l), lambda i: (0, i))   # lane-dense out

    kernel = functools.partial(
        mlp_plus_branch_kernel, height=height, width=width, chans=chans,
        scale=SCALE, roll_is_jnp_like=_roll_is_jnp_like())

    # Advisory cost / VMEM hints (rough; helps XLA scheduling around the call).
    in_item = jnp.dtype(compute_dtype).itemsize
    param_bytes = sum(int(a.size) * jnp.dtype(a.dtype).itemsize for a in args[1:])
    tap_flops = 2 * sum(k * k * c for k, c in zip(SCALE, chans))
    flops = total_l * (2 * cin * hidden + tap_flops + 2 * hidden * cout + 8 * hidden)
    cost = pl.CostEstimate(
        flops=int(flops),
        transcendentals=int(2 * hidden * total_l),
        bytes_accessed=int(total_l * cin * in_item + total_l * cout * 4 + param_bytes))
    tile_bytes = (2 * tile_l * cin * in_item + 2 * cout * tile_l * 4
                  + 6 * hidden * tile_l * 4 + 2 * param_bytes)
    vmem_limit = int(max(32 * 1024 * 1024, min(2 * tile_bytes, 48 * 1024 * 1024)))

    return pl.pallas_call(
        kernel,
        out_shape=jax.ShapeDtypeStruct((cout, total_l), x2d.dtype),
        grid=grid,
        in_specs=in_specs,
        out_specs=out_specs,
        compiler_params=pltpu.CompilerParams(
            dimension_semantics=("parallel",),   # shards tiles over TCs on v7x
            vmem_limit_bytes=vmem_limit),
        cost_estimate=cost,
    )(*args)


def mlp_plus_forward(x, params, *, compute_dtype=jnp.bfloat16):
    """x: [B, N, C] tokens; first 64 = 8x8 template, rest = SxS search grid."""
    b, n, c = x.shape
    nz, sz = 64, 8
    nx = n - nz
    sx = int(math.isqrt(nx))
    assert sx * sx == nx, "search token count must be a perfect square"

    outs = []
    for lo, hi, hgt, wid in ((0, nz, sz, sz), (nz, n, sx, sx)):
        ntok = hi - lo
        xb = x[:, lo:hi, :].reshape(b * ntok, c)        # token-major branch slab
        ob = run_mlp_plus_branch(xb, params, height=hgt, width=wid,
                                 compute_dtype=compute_dtype)    # [Cout, b*ntok]
        cout = ob.shape[0]
        outs.append(jnp.transpose(ob, (1, 0)).reshape(b, ntok, cout))
    return jnp.concatenate(outs, axis=1)


# ---------------------------------------------------------------------------
# Parameters (synthetic, deterministic) and a pure-JAX reference
# ---------------------------------------------------------------------------
def make_params(key, in_features, hidden_features):
    """Deterministic synthetic parameters matching the PyTorch module (folded BN)."""
    eps = 1e-5
    ks = jax.random.split(key, 12)

    def bn_fold(k, ch):
        k1, k2, k3, k4 = jax.random.split(k, 4)
        gamma = 1.0 + 0.1 * jax.random.normal(k1, (ch,), jnp.float32)
        beta = 0.1 * jax.random.normal(k2, (ch,), jnp.float32)
        mean = 0.1 * jax.random.normal(k3, (ch,), jnp.float32)
        var = jax.random.uniform(k4, (ch,), jnp.float32, 0.5, 1.5)
        s = gamma / jnp.sqrt(var + eps)
        b = beta - mean * s
        return s.reshape(ch, 1), b.reshape(ch, 1)

    # fc1 conv weight [hidden, Cin, 1, 1] -> [hidden, Cin]
    w1t = 0.02 * jax.random.normal(ks[0], (hidden_features, in_features), jnp.float32)
    bn1_s, bn1_b = bn_fold(ks[1], hidden_features)

    # MultiScaleDWConv: each group's kxk depthwise kernel packed into a
    # [hidden, 49] slab (7x7 tap grid, zeros outside the group's window).
    chans = _group_channels(hidden_features)
    dw_w = jnp.zeros((hidden_features, 49), jnp.float32)
    dw_b = []
    c0 = 0
    for i, (k_sz, ch) in enumerate(zip(SCALE, chans)):
        kk1, kk2 = jax.random.split(ks[2 + i], 2)
        w = 0.1 * jax.random.normal(kk1, (ch, k_sz, k_sz), jnp.float32)
        bias = 0.05 * jax.random.normal(kk2, (ch,), jnp.float32)
        off = (7 - k_sz) // 2
        slab = jnp.zeros((ch, 7, 7), jnp.float32)
        slab = slab.at[:, off:off + k_sz, off:off + k_sz].set(w)
        dw_w = dw_w.at[c0:c0 + ch, :].set(slab.reshape(ch, 49))
        dw_b.append(bias)
        c0 += ch
    dw_b = jnp.concatenate(dw_b).reshape(hidden_features, 1)

    bn2_s, bn2_b = bn_fold(ks[8], hidden_features)

    # fc2 conv weight [Cout, hidden, 1, 1] -> [Cout, hidden]
    w2t = 0.02 * jax.random.normal(ks[9], (in_features, hidden_features), jnp.float32)
    bn3_s, bn3_b = bn_fold(ks[10], in_features)

    return dict(w1t=w1t, bn1_s=bn1_s, bn1_b=bn1_b, dw_w=dw_w, dw_b=dw_b,
                bn2_s=bn2_s, bn2_b=bn2_b, w2t=w2t, bn3_s=bn3_s, bn3_b=bn3_b)


def mlp_plus_reference(x, params):
    """Pure-JAX reference (NHWC pad + explicit taps), mirrors the PyTorch module."""
    def branch(t):
        b, nt, c = t.shape
        s = int(math.isqrt(nt))
        xi = t.reshape(b, s, s, c)
        h = jnp.einsum("bhwc,kc->bhwk", xi, params["w1t"])
        h = _gelu(h)
        h = h * params["bn1_s"][:, 0] + params["bn1_b"][:, 0]
        hp = jnp.pad(h, ((0, 0), (3, 3), (3, 3), (0, 0)))
        y = h + params["dw_b"][:, 0]
        for dy in range(7):
            for dx in range(7):
                w = params["dw_w"][:, dy * 7 + dx]
                y = y + hp[:, dy:dy + s, dx:dx + s, :] * w
        y = _gelu(y)
        y = y * params["bn2_s"][:, 0] + params["bn2_b"][:, 0]
        o = jnp.einsum("bhwk,ok->bhwo", y, params["w2t"])
        o = o * params["bn3_s"][:, 0] + params["bn3_b"][:, 0]
        return o.reshape(b, nt, -1)

    return jnp.concatenate([branch(x[:, :64, :]), branch(x[:, 64:, :])], axis=1)


if __name__ == "__main__":
    key = jax.random.PRNGKey(0)
    k_x, k_p = jax.random.split(key)

    B = 8                       # small, but enough images to exercise multi-step grids
    in_features = 16            # embedding dim C
    hidden_features = 32
    N = 64 + 16 * 16            # 64 template tokens (8x8) + 256 search tokens (16x16)

    x = jax.random.normal(k_x, (B, N, in_features), jnp.float32)
    params = make_params(k_p, in_features, hidden_features)

    _roll_is_jnp_like()         # probe the roll convention once, outside any trace

    forward = jax.jit(mlp_plus_forward)
    out = forward(x, params)
    jax.block_until_ready(out)

    assert out.shape == (B, N, in_features), out.shape
    assert bool(jnp.all(jnp.isfinite(out)))

    ref = mlp_plus_reference(x, params)
    err = float(jnp.max(jnp.abs(out - ref)))
    assert err < 2e-2, f"kernel/reference mismatch: max abs err {err}"
    print("KERNEL_OK")
</pallas_src>

<mosaic_0001>
module attributes {stable_mosaic.version = 11 : i64} {
  func.func @_roll_probe_kernel(%arg0: memref<8x128xf32, #tpu.memory_space<vmem>>, %arg1: memref<8x128xf32, #tpu.memory_space<vmem>>) attributes {dimension_semantics = [], scalar_prefetch = 0 : i64, scratch_operands = 0 : i64, tpu.core_type = #tpu.core_type<tc>} {
    %c0 = arith.constant 0 : index
    %c0_0 = arith.constant 0 : index
    %0 = vector.load %arg0[%c0, %c0_0] : memref<8x128xf32, #tpu.memory_space<vmem>>, vector<8x128xf32>
    %c1_i32 = arith.constant 1 : i32
    %1 = tpu.dynamic_rotate %0 by %c1_i32 dim 1 : vector<8x128xf32>, i32 -> vector<8x128xf32>
    %c0_1 = arith.constant 0 : index
    %c0_2 = arith.constant 0 : index
    %2 = vector.load %arg1[%c0_1, %c0_2] : memref<8x128xf32, #tpu.memory_space<vmem>>, vector<8x128xf32>
    tpu.vector_store %arg1[%c0_1, %c0_2], %1 {strides = array<i32>} : memref<8x128xf32, #tpu.memory_space<vmem>>, vector<8x128xf32>,
    return
  }
}

</mosaic_0001>

<bundles_post_ra>
// kernel: tpu_custom_call.1
= control target key start
LH: loop header
LB: loop body
LE: loop exit
PB: predicated region body
PF: predicated region fallthrough
CT: control target
= control target key end

     0   :  { %6 = vsyncpa [#allocation3], 0  ;;  %s128_s0 = inlined_call_operand.hbm [shape: f32[8,128], index: 0, kind: input, shape index: {}]   ;;  %s129_s1 = inlined_call_operand.hbm [shape: f32[8,128], index: 1, kind: output, shape index: {}]  }
   0x1   :  { %7 = vsyncpa [#allocation4], 0  ;;  %s91_s6 = smov [#allocation2]   ;;  %s43_s10 = scalar_lea.hbm %s128_s0, 128 }
   0x2   :  { %s14_s7 = sshll.u32 %s91_s6, 4  ;;  %p44_p0 = scmp.ne.s32.totalorder %s128_s0, %s43_s10  ;;  %s15_s7 = int_to_ptr.vmem [resolvable:$true] %s14_s7 }
   0x3   :  { %p47_p1 = scmp.lt.u32.totalorder %s43_s10, %s128_s0 }
   0x5   :  { %p49_p2 = pnand %p47_p1, %p44_p0 }
   0x7   :  { %52 = shalt.err (!%p49_p2)
}
   0x8   :  { %s53_s15 = scalar_lea.vmem %s15_s7, 128  ;;  %p58_p4 = scmp.lt.s32.totalorder %s15_s7, %s15_s7 }
   0x9   :  { %p54_p3 = scmp.ne.s32.totalorder %s15_s7, %s53_s15  ;;  %p59_p5 = scmp.lt.s32.totalorder %s53_s15, %s53_s15 }
   0xb   :  { %p60_p6 = por %p59_p5, %p58_p4 }
   0xd   :  { %p61_p7 = pnand %p60_p6, %p54_p3 }
   0xf   :  { %64 = shalt.err (!%p61_p7)
}
  0x10   :  { %17 = dma.hbm_to_vmem [thread:$0]  %s128_s0, 128, %s15_s7, [#allocation3]  }
  0x11   :  { %87 = dma.done.wait [#allocation3], 128  }
  0x12   :  { %88 = vsyncadd [#allocation3], 4294967168  ;;  %v21_v0 = vld [vmem:[#allocation2] sm:$0xff]  ;;  %s92_s18 = smov 1   ;;  %s93_s19 = smov [#allocation5]  }
  0x13   :  { %22 = vrot.lane.b32.xlu0 %v21_v0, %s92_s18  ;;  %s31_s20 = sshll.u32 %s93_s19, 4  ;;  %s32_s20 = int_to_ptr.vmem [resolvable:$true] %s31_s20 }
  0x14   :  { %s65_s21 = scalar_lea.vmem %s32_s20, 128  ;;  %p70_p9 = scmp.lt.s32.totalorder %s32_s20, %s32_s20 }
  0x15   :  { %p66_p8 = scmp.ne.s32.totalorder %s32_s20, %s65_s21  ;;  %p71_p10 = scmp.lt.s32.totalorder %s65_s21, %s65_s21 }
  0x17   :  { %p72_p11 = por %p71_p10, %p70_p9 }
  0x19   :  { %p73_p12 = pnand %p72_p11, %p66_p8 }
  0x85   :  { %v23_v1 = vpop.permute.xlu0 %22 }
  0x86   :  { %24 = vst [vmem:[#allocation5] sm:$0xff] %v23_v1 }
  0x87   :  { %76 = shalt.err (!%p73_p12)
}
  0x88   :  { %s77_s0 = scalar_lea.hbm %s129_s1, 128 }
  0x89   :  { %p78_p13 = scmp.ne.s32.totalorder %s129_s1, %s77_s0  ;;  %p81_p0 = scmp.lt.u32.totalorder %s77_s0, %s129_s1 }
  0x8b   :  { %p83_p1 = pnand %p81_p0, %p78_p13 }
  0x8d   :  { %86 = shalt.err (!%p83_p1)
}
  0x8e   :  { %34 = dma.vmem_to_hbm [thread:$0]  %s32_s20, 128, %s129_s1, [#allocation4]  }
  0x8f   :  { %89 = dma.done.wait [#allocation4], 128  }
  0x90   :  { %90 = vsyncadd [#allocation4], 4294967168 }
  0x91   :  { %38 = vsyncpa [#allocation3], 1 }
  0x92   :  { %39 = vsyncpa [#allocation4], 1 }

</bundles_post_ra>
